<compile_context>
chip_gen: v7x
topology: tpu7x:2x2x1
jax: 0.10.0
libtpu: 0.0.40
codegen_flags: <defaults>
</compile_context>

<pallas_src>
import functools
import math

import jax
import jax.numpy as jnp
from jax.experimental import pallas as pl
from jax.experimental.pallas import tpu as pltpu

EPS = 1e-6
NEG_SLOPE = 0.01  # default for both LeakyReLU() and VNLeakyReLU()


def _gdb_perceptron_vn_kernel(
    sca_ref,     # (TM, Cs_in)
    vec_ref,     # (3, TM, Cv_in)   component-major, lane = channel
    w1t_ref,     # (Cv_in, H)       lin_vector.weight.T
    w2t_ref,     # (H, Cv_out)      lin_vector2.weight.T
    ws1t_ref,    # (Cs_in, Hs)      lin_scalar_1.weight.T
    ws2tn_ref,   # (H, Cs_out)      lin_scalar_2.weight.T rows acting on |v|
    ws2ts_ref,   # (Hs, Cs_out)     lin_scalar_2.weight.T rows acting on z_sca
    wgt_ref,     # (Cs_out, Cv_out) scalar_to_vector_gates.weight.T
    bg_ref,      # (1, Cv_out)      scalar_to_vector_gates.bias (lane-dense)
    wdt_ref,     # (Cv_out, Cv_out) act_vec.map_to_dir.weight.T
    osca_ref,    # (TM, Cs_out)
    ovec_ref,    # (3, TM, Cv_out)
):
    f32 = jnp.float32
    tm = sca_ref.shape[0]
    c_v_in = vec_ref.shape[-1]
    hidden = w1t_ref.shape[-1]
    c_v_out = w2t_ref.shape[-1]

    # --- GDBLinear: lin_vector. Fold the 3 spatial components into the M axis
    # (layout-preserving merge of leading dims) -> ONE MXU matmul per weight.
    v = vec_ref[...].reshape(3 * tm, c_v_in)
    v_inter = jnp.dot(v, w1t_ref[...], preferred_element_type=f32)      # (3*TM, H)
    v_inter3 = v_inter.reshape(3, tm, hidden)

    # --- scalar branch: ||v_inter||_2 over components + lin_scalar_1/2 ---
    norm = jnp.sqrt(v_inter3[0] ** 2 + v_inter3[1] ** 2 + v_inter3[2] ** 2)  # (TM, H)
    z_sca = jnp.dot(sca_ref[...], ws1t_ref[...], preferred_element_type=f32)  # (TM, Hs)
    # lin_scalar_2(concat([norm, z_sca])) == split matmul (no lane concat).
    out_sca = (jnp.dot(norm, ws2tn_ref[...], preferred_element_type=f32)
               + jnp.dot(z_sca, ws2ts_ref[...], preferred_element_type=f32))  # (TM, Cs_out)

    # --- sigmoid gating + lin_vector2 (components still folded) ---
    gate = jax.nn.sigmoid(
        jnp.dot(out_sca, wgt_ref[...], preferred_element_type=f32)
        + bg_ref[...].astype(f32))                                       # (TM, Cv_out)
    xv = (jnp.dot(v_inter, w2t_ref[...], preferred_element_type=f32)
          .reshape(3, tm, c_v_out) * gate)                               # (3, TM, Cv_out)

    # --- VNLeakyReLU on the vector stream ---
    d_dir = jnp.dot(xv.reshape(3 * tm, c_v_out), wdt_ref[...],
                    preferred_element_type=f32).reshape(3, tm, c_v_out)
    dot = (xv * d_dir).sum(axis=0)                                       # (TM, Cv_out)
    dnsq = (d_dir * d_dir).sum(axis=0)                                   # (TM, Cv_out)
    denom = dnsq + EPS
    r = pl.reciprocal(denom, approx=True)
    r = r * (2.0 - denom * r)            # one Newton step -> ~f32-exact reciprocal
    proj = dot * r
    neg_branch = NEG_SLOPE * xv + (1.0 - NEG_SLOPE) * (xv - proj * d_dir)
    ovec_ref[...] = jnp.where(dot >= 0, xv, neg_branch).astype(ovec_ref.dtype)

    # --- LeakyReLU on the scalar stream ---
    osca_ref[...] = jnp.where(out_sca >= 0, out_sca,
                              NEG_SLOPE * out_sca).astype(osca_ref.dtype)


def _cdiv(a, b):
    return (a + b - 1) // b


def _round_up(x, n):
    return _cdiv(x, n) * n


def _pick_tile_m(m, block_m, lanes_io, lanes_inter, itemsize, weight_bytes, vmem_cap):
    # Per-row VMEM footprint: double-buffered input/output blocks (io dtype)
    # plus traced f32 intermediates that live in VMEM scratch.
    bytes_per_row = itemsize * lanes_io + 4 * lanes_inter
    budget = max(vmem_cap // 2 - weight_bytes, 1 << 20)
    tm_cap = max(8, (budget // max(bytes_per_row, 1)) // 8 * 8)
    tm = max(8, min(block_m, tm_cap, _round_up(m, 8)) // 8 * 8)
    # Keep the grid >= 2 when there is enough work (feeds both v7x TensorCores
    # via the "parallel" axis; one extra ~0.35us grid step is noise on 1-TC
    # chips) and rebalance so the ragged last block is not tiny (bounds the
    # wasted rows to < 8 per tile without any jnp.pad / extra HBM copy).
    n_tiles = max(_cdiv(m, tm), 2 if m >= 16 else 1)
    return _round_up(_cdiv(m, n_tiles), 8)


@functools.partial(jax.jit, static_argnames=("block_m", "component_major_io"))
def gdb_perceptron_vn(feat_scalar, feat_vector, params, *, block_m=2048,
                      component_major_io=False):
    """Fused GDBPerceptronVN forward.

    component_major_io=False (PyTorch layout):
        feat_scalar: (..., in_scalar), feat_vector: (..., in_vector, 3)
        returns ((..., out_scalar), (..., out_vector, 3))
    component_major_io=True (lane-dense resident layout for chained layers):
        feat_scalar: (..., in_scalar), feat_vector: (3, ..., in_vector)
        returns ((..., out_scalar), (3, ..., out_vector))
    """
    *lead, c_s_in = feat_scalar.shape
    m = math.prod(lead) if lead else 1
    sca2d = feat_scalar.reshape(m, c_s_in)

    if component_major_io:
        assert feat_vector.shape[0] == 3
        c_v_in = feat_vector.shape[-1]
        vec3d = feat_vector.reshape(3, m, c_v_in)          # no-op reshape
    else:
        c_v_in, vdim = feat_vector.shape[-2:]
        assert vdim == 3
        # One transpose at the model boundary. Chained GDBPerceptronVN layers
        # should pass component_major_io=True to keep (3, M, C) resident.
        vec3d = jnp.transpose(feat_vector.reshape(m, c_v_in, 3), (2, 0, 1))

    w1 = params["lin_vector_w"]       # (H, Cv_in)
    w2 = params["lin_vector2_w"]      # (Cv_out, H)
    ws1 = params["lin_scalar_1_w"]    # (Hs, Cs_in)
    ws2 = params["lin_scalar_2_w"]    # (Cs_out, H + Hs)
    wg = params["gates_w"]            # (Cv_out, Cs_out)
    bg = params["gates_b"]            # (Cv_out,)
    wd = params["map_to_dir_w"]       # (Cv_out, Cv_out)

    hidden = w1.shape[0]
    sca_hidden = ws1.shape[0]
    c_s_out = ws2.shape[0]
    c_v_out = w2.shape[0]

    dtype = feat_vector.dtype
    itemsize = jnp.dtype(dtype).itemsize

    # Pre-transposed weights so the kernel runs plain x @ W matmuls; cast to
    # the feature dtype (native bf16 MXU path if the caller runs in bf16).
    w1t = w1.T.astype(dtype)
    w2t = w2.T.astype(dtype)
    ws1t = ws1.T.astype(dtype)
    ws2t = ws2.T
    ws2tn = ws2t[:hidden].astype(dtype)
    ws2ts = ws2t[hidden:].astype(dtype)
    wgt = wg.T.astype(dtype)
    bg2 = bg.reshape(1, c_v_out).astype(jnp.float32)
    wdt = wd.T.astype(dtype)

    weight_bytes = 2 * itemsize * (w1t.size + w2t.size + ws1t.size + ws2tn.size
                                   + ws2ts.size + wgt.size + wdt.size) + 8 * bg2.size

    try:
        vmem_cap = int(pltpu.get_tpu_info().vmem_capacity_bytes)
    except Exception:  # pragma: no cover - conservative fallback
        vmem_cap = 64 * 1024 * 1024

    lanes_io = 2 * (c_s_in + 3 * c_v_in + c_s_out + 3 * c_v_out)
    lanes_inter = 3 * c_v_in + 4 * hidden + sca_hidden + 2 * c_s_out + 14 * c_v_out
    tm = _pick_tile_m(m, block_m, lanes_io, lanes_inter, itemsize,
                      weight_bytes, vmem_cap)
    grid = _cdiv(m, tm)
    vmem_limit = min(vmem_cap * 3 // 4, 96 * 1024 * 1024)

    flops = 2 * m * (3 * c_v_in * hidden + 3 * hidden * c_v_out
                     + 3 * c_v_out * c_v_out + hidden * c_s_out
                     + c_s_in * sca_hidden + sca_hidden * c_s_out
                     + c_s_out * c_v_out)
    transcendentals = m * (hidden + 2 * c_v_out)   # sqrt + sigmoid + reciprocal
    bytes_accessed = (itemsize * m * (c_s_in + 3 * c_v_in + c_s_out + 3 * c_v_out)
                      + weight_bytes)
    cost = pl.CostEstimate(flops=int(flops), transcendentals=int(transcendentals),
                           bytes_accessed=int(bytes_accessed))

    out_sca, out_vec = pl.pallas_call(
        _gdb_perceptron_vn_kernel,
        out_shape=(
            jax.ShapeDtypeStruct((m, c_s_out), dtype),
            jax.ShapeDtypeStruct((3, m, c_v_out), dtype),
        ),
        grid_spec=pltpu.PrefetchScalarGridSpec(
            num_scalar_prefetch=0,
            grid=(grid,),
            in_specs=[
                pl.BlockSpec((tm, c_s_in), lambda i: (i, 0)),
                pl.BlockSpec((3, tm, c_v_in), lambda i: (0, i, 0)),
                pl.BlockSpec((c_v_in, hidden), lambda i: (0, 0)),
                pl.BlockSpec((hidden, c_v_out), lambda i: (0, 0)),
                pl.BlockSpec((c_s_in, sca_hidden), lambda i: (0, 0)),
                pl.BlockSpec((hidden, c_s_out), lambda i: (0, 0)),
                pl.BlockSpec((sca_hidden, c_s_out), lambda i: (0, 0)),
                pl.BlockSpec((c_s_out, c_v_out), lambda i: (0, 0)),
                pl.BlockSpec((1, c_v_out), lambda i: (0, 0)),
                pl.BlockSpec((c_v_out, c_v_out), lambda i: (0, 0)),
            ],
            out_specs=(
                pl.BlockSpec((tm, c_s_out), lambda i: (i, 0)),
                pl.BlockSpec((3, tm, c_v_out), lambda i: (0, i, 0)),
            ),
        ),
        compiler_params=pltpu.CompilerParams(
            dimension_semantics=("parallel",),
            vmem_limit_bytes=int(vmem_limit)),
        cost_estimate=cost,
    )(sca2d, vec3d, w1t, w2t, ws1t, ws2tn, ws2ts, wgt, bg2, wdt)

    out_sca = out_sca.reshape(*lead, c_s_out)
    if component_major_io:
        out_vec = out_vec.reshape(3, *lead, c_v_out)
    else:
        out_vec = jnp.transpose(out_vec, (1, 2, 0)).reshape(*lead, c_v_out, 3)
    return out_sca, out_vec


def init_gdb_perceptron_vn_params(key, in_scalar, in_vector, out_scalar,
                                  out_vector, bottleneck=1, dtype=jnp.float32):
    """Deterministic init mirroring the PyTorch module (nn.Linear uniform init)."""
    if isinstance(bottleneck, int):
        sca_bottleneck = vec_bottleneck = bottleneck
    else:
        sca_bottleneck, vec_bottleneck = bottleneck
    assert in_vector % vec_bottleneck == 0
    assert in_scalar % sca_bottleneck == 0
    sca_hidden = in_scalar // sca_bottleneck if sca_bottleneck > 1 else max(in_vector, out_vector)
    hidden = in_vector // vec_bottleneck if vec_bottleneck > 1 else max(in_vector, out_vector)

    def linear_w(k, fan_in, fan_out):
        bound = 1.0 / math.sqrt(fan_in)
        return jax.random.uniform(k, (fan_out, fan_in), dtype,
                                  minval=-bound, maxval=bound)

    keys = jax.random.split(key, 7)
    bound_g = 1.0 / math.sqrt(out_scalar)
    return {
        "lin_vector_w": linear_w(keys[0], in_vector, hidden),
        "lin_vector2_w": linear_w(keys[1], hidden, out_vector),
        "lin_scalar_1_w": linear_w(keys[2], in_scalar, sca_hidden),
        "lin_scalar_2_w": linear_w(keys[3], hidden + sca_hidden, out_scalar),
        "gates_w": linear_w(keys[4], out_scalar, out_vector),
        "gates_b": jax.random.uniform(keys[5], (out_vector,), dtype,
                                      minval=-bound_g, maxval=bound_g),
        "map_to_dir_w": linear_w(keys[6], out_vector, out_vector),
    }


def gdb_perceptron_vn_reference(feat_scalar, feat_vector, params):
    """Pure-JAX reference matching the PyTorch forward exactly."""
    w1, w2 = params["lin_vector_w"], params["lin_vector2_w"]
    ws1, ws2 = params["lin_scalar_1_w"], params["lin_scalar_2_w"]
    wg, bg, wd = params["gates_w"], params["gates_b"], params["map_to_dir_w"]

    v_inter = jnp.einsum("...id,hi->...hd", feat_vector, w1)
    v_norm = jnp.sqrt(jnp.sum(v_inter ** 2, axis=-1))
    z_sca = feat_scalar @ ws1.T
    cat = jnp.concatenate([v_norm, z_sca], axis=-1)
    out_sca = cat @ ws2.T
    gate = jax.nn.sigmoid(out_sca @ wg.T + bg)[..., None]
    out_vec = gate * jnp.einsum("...hd,oh->...od", v_inter, w2)

    d = jnp.einsum("...id,oi->...od", out_vec, wd)
    dot = jnp.sum(out_vec * d, axis=-1, keepdims=True)
    mask = (dot >= 0).astype(out_vec.dtype)
    dnsq = jnp.sum(d * d, axis=-1, keepdims=True)
    vec_out = (NEG_SLOPE * out_vec
               + (1 - NEG_SLOPE) * (mask * out_vec
                                    + (1 - mask) * (out_vec - dot / (dnsq + EPS) * d)))
    sca_out = jnp.where(out_sca >= 0, out_sca, NEG_SLOPE * out_sca)
    return sca_out, vec_out


if __name__ == "__main__":
    key = jax.random.PRNGKey(0)
    k_s, k_v, k_p = jax.random.split(key, 3)

    batch, n_points = 2, 16
    in_scalar, in_vector, out_scalar, out_vector = 16, 8, 32, 16

    feat_scalar = jax.random.normal(k_s, (batch, n_points, in_scalar), jnp.float32)
    feat_vector = jax.random.normal(k_v, (batch, n_points, in_vector, 3), jnp.float32)
    params = init_gdb_perceptron_vn_params(k_p, in_scalar, in_vector,
                                           out_scalar, out_vector, bottleneck=1)

    ref_sca, ref_vec = gdb_perceptron_vn_reference(feat_scalar, feat_vector, params)

    # --- PyTorch layout path (module-facing) ---
    out_sca, out_vec = gdb_perceptron_vn(feat_scalar, feat_vector, params)
    jax.block_until_ready((out_sca, out_vec))
    assert out_sca.shape == (batch, n_points, out_scalar)
    assert out_vec.shape == (batch, n_points, out_vector, 3)
    assert jnp.allclose(out_sca, ref_sca, atol=1e-4, rtol=1e-4), \
        float(jnp.max(jnp.abs(out_sca - ref_sca)))
    assert jnp.allclose(out_vec, ref_vec, atol=1e-4, rtol=1e-4), \
        float(jnp.max(jnp.abs(out_vec - ref_vec)))

    # --- component-major resident-layout path (for chained layers) ---
    m = batch * n_points
    sca_flat = feat_scalar.reshape(m, in_scalar)
    vec_cm = jnp.transpose(feat_vector.reshape(m, in_vector, 3), (2, 0, 1))
    cm_sca, cm_vec = gdb_perceptron_vn(sca_flat, vec_cm, params,
                                       component_major_io=True)
    jax.block_until_ready((cm_sca, cm_vec))
    ref_vec_cm = jnp.transpose(ref_vec.reshape(m, out_vector, 3), (2, 0, 1))
    assert jnp.allclose(cm_sca, ref_sca.reshape(m, out_scalar), atol=1e-4, rtol=1e-4)
    assert jnp.allclose(cm_vec, ref_vec_cm, atol=1e-4, rtol=1e-4)

    print("KERNEL_OK")
</pallas_src>

<mosaic_0001>
module attributes {stable_mosaic.version = 11 : i64} {
  func.func @_gdb_perceptron_vn_kernel(%arg0: i32, %arg1: memref<16x16xf32, #tpu.memory_space<vmem>>, %arg2: memref<3x16x8xf32, #tpu.memory_space<vmem>>, %arg3: memref<8x16xf32, #tpu.memory_space<vmem>>, %arg4: memref<16x16xf32, #tpu.memory_space<vmem>>, %arg5: memref<16x16xf32, #tpu.memory_space<vmem>>, %arg6: memref<16x32xf32, #tpu.memory_space<vmem>>, %arg7: memref<16x32xf32, #tpu.memory_space<vmem>>, %arg8: memref<32x16xf32, #tpu.memory_space<vmem>>, %arg9: memref<1x16xf32, #tpu.memory_space<vmem>>, %arg10: memref<16x16xf32, #tpu.memory_space<vmem>>, %arg11: memref<16x32xf32, #tpu.memory_space<vmem>>, %arg12: memref<3x16x16xf32, #tpu.memory_space<vmem>>) attributes {dimension_semantics = [#tpu.dimension_semantics<parallel>], iteration_bounds = array<i64: 2>, scalar_prefetch = 0 : i64, scratch_operands = 0 : i64, tpu.core_type = #tpu.core_type<tc>, window_params = [{transform_indices = @transform_0, window_bounds = array<i64: 16, 16>}, {transform_indices = @transform_1, window_bounds = array<i64: 3, 16, 8>}, {pipeline_mode = #tpu.pipeline_mode<synchronous>, transform_indices = @transform_2, window_bounds = array<i64: 8, 16>}, {pipeline_mode = #tpu.pipeline_mode<synchronous>, transform_indices = @transform_3, window_bounds = array<i64: 16, 16>}, {pipeline_mode = #tpu.pipeline_mode<synchronous>, transform_indices = @transform_4, window_bounds = array<i64: 16, 16>}, {pipeline_mode = #tpu.pipeline_mode<synchronous>, transform_indices = @transform_5, window_bounds = array<i64: 16, 32>}, {pipeline_mode = #tpu.pipeline_mode<synchronous>, transform_indices = @transform_6, window_bounds = array<i64: 16, 32>}, {pipeline_mode = #tpu.pipeline_mode<synchronous>, transform_indices = @transform_7, window_bounds = array<i64: 32, 16>}, {pipeline_mode = #tpu.pipeline_mode<synchronous>, transform_indices = @transform_8, window_bounds = array<i64: 1, 16>}, {pipeline_mode = #tpu.pipeline_mode<synchronous>, transform_indices = @transform_9, window_bounds = array<i64: 16, 16>}, {transform_indices = @transform_10, window_bounds = array<i64: 16, 32>}, {transform_indices = @transform_11, window_bounds = array<i64: 3, 16, 16>}]} {
    %c0 = arith.constant 0 : index
    %c0_0 = arith.constant 0 : index
    %c0_1 = arith.constant 0 : index
    %0 = vector.load %arg2[%c0, %c0_0, %c0_1] : memref<3x16x8xf32, #tpu.memory_space<vmem>>, vector<3x16x8xf32>
    %1 = vector.shape_cast %0 : vector<3x16x8xf32> to vector<48x8xf32>
    %c0_2 = arith.constant 0 : index
    %c0_3 = arith.constant 0 : index
    %2 = vector.load %arg3[%c0_2, %c0_3] : memref<8x16xf32, #tpu.memory_space<vmem>>, vector<8x16xf32>
    %cst = arith.constant dense<0.000000e+00> : vector<48x16xf32>
    %3 = tpu.matmul %1, %2, %cst {dimension_numbers = #tpu.dot_dimension_numbers<[1], [0], [0], [1], [0, 0, 1, 1], [], []>} : vector<48x8xf32>, vector<8x16xf32>, vector<48x16xf32> -> vector<48x16xf32>
    %4 = vector.shape_cast %3 : vector<48x16xf32> to vector<3x16x16xf32>
    %5 = vector.extract_strided_slice %4 {offsets = [0, 0, 0], sizes = [1, 16, 16], strides = [1, 1, 1]} : vector<3x16x16xf32> to vector<1x16x16xf32>
    %6 = vector.shape_cast %5 : vector<1x16x16xf32> to vector<16x16xf32>
    %7 = arith.mulf %6, %6 : vector<16x16xf32>
    %8 = vector.extract_strided_slice %4 {offsets = [1, 0, 0], sizes = [1, 16, 16], strides = [1, 1, 1]} : vector<3x16x16xf32> to vector<1x16x16xf32>
    %9 = vector.shape_cast %8 : vector<1x16x16xf32> to vector<16x16xf32>
    %10 = arith.mulf %9, %9 : vector<16x16xf32>
    %11 = arith.addf %7, %10 : vector<16x16xf32>
    %12 = vector.extract_strided_slice %4 {offsets = [2, 0, 0], sizes = [1, 16, 16], strides = [1, 1, 1]} : vector<3x16x16xf32> to vector<1x16x16xf32>
    %13 = vector.shape_cast %12 : vector<1x16x16xf32> to vector<16x16xf32>
    %14 = arith.mulf %13, %13 : vector<16x16xf32>
    %15 = arith.addf %11, %14 : vector<16x16xf32>
    %16 = math.sqrt %15 : vector<16x16xf32>
    %c0_4 = arith.constant 0 : index
    %c0_5 = arith.constant 0 : index
    %17 = vector.load %arg1[%c0_4, %c0_5] : memref<16x16xf32, #tpu.memory_space<vmem>>, vector<16x16xf32>
    %c0_6 = arith.constant 0 : index
    %c0_7 = arith.constant 0 : index
    %18 = vector.load %arg5[%c0_6, %c0_7] : memref<16x16xf32, #tpu.memory_space<vmem>>, vector<16x16xf32>
    %cst_8 = arith.constant dense<0.000000e+00> : vector<16x16xf32>
    %19 = tpu.matmul %17, %18, %cst_8 {dimension_numbers = #tpu.dot_dimension_numbers<[1], [0], [0], [1], [0, 0, 1, 1], [], []>} : vector<16x16xf32>, vector<16x16xf32>, vector<16x16xf32> -> vector<16x16xf32>
    %c0_9 = arith.constant 0 : index
    %c0_10 = arith.constant 0 : index
    %20 = vector.load %arg6[%c0_9, %c0_10] : memref<16x32xf32, #tpu.memory_space<vmem>>, vector<16x32xf32>
    %cst_11 = arith.constant dense<0.000000e+00> : vector<16x32xf32>
    %21 = tpu.matmul %16, %20, %cst_11 {dimension_numbers = #tpu.dot_dimension_numbers<[1], [0], [0], [1], [0, 0, 1, 1], [], []>} : vector<16x16xf32>, vector<16x32xf32>, vector<16x32xf32> -> vector<16x32xf32>
    %c0_12 = arith.constant 0 : index
    %c0_13 = arith.constant 0 : index
    %22 = vector.load %arg7[%c0_12, %c0_13] : memref<16x32xf32, #tpu.memory_space<vmem>>, vector<16x32xf32>
    %cst_14 = arith.constant dense<0.000000e+00> : vector<16x32xf32>
    %23 = tpu.matmul %19, %22, %cst_14 {dimension_numbers = #tpu.dot_dimension_numbers<[1], [0], [0], [1], [0, 0, 1, 1], [], []>} : vector<16x16xf32>, vector<16x32xf32>, vector<16x32xf32> -> vector<16x32xf32>
    %24 = arith.addf %21, %23 : vector<16x32xf32>
    %c0_15 = arith.constant 0 : index
    %c0_16 = arith.constant 0 : index
    %25 = vector.load %arg8[%c0_15, %c0_16] : memref<32x16xf32, #tpu.memory_space<vmem>>, vector<32x16xf32>
    %cst_17 = arith.constant dense<0.000000e+00> : vector<16x16xf32>
    %26 = tpu.matmul %24, %25, %cst_17 {dimension_numbers = #tpu.dot_dimension_numbers<[1], [0], [0], [1], [0, 0, 1, 1], [], []>} : vector<16x32xf32>, vector<32x16xf32>, vector<16x16xf32> -> vector<16x16xf32>
    %c0_18 = arith.constant 0 : index
    %c0_19 = arith.constant 0 : index
    %27 = vector.load %arg9[%c0_18, %c0_19] : memref<1x16xf32, #tpu.memory_space<vmem>>, vector<1x16xf32>
    %28 = vector.broadcast %27 : vector<1x16xf32> to vector<16x16xf32>
    %29 = arith.addf %26, %28 : vector<16x16xf32>
    %30 = arith.negf %29 : vector<16x16xf32>
    %31 = math.exp %30 : vector<16x16xf32>
    %cst_20 = arith.constant 1.000000e+00 : f32
    %32 = vector.broadcast %cst_20 : f32 to vector<16x16xf32>
    %33 = arith.addf %32, %31 : vector<16x16xf32>
    %34 = arith.divf %32, %33 : vector<16x16xf32>
    %c0_21 = arith.constant 0 : index
    %c0_22 = arith.constant 0 : index
    %35 = vector.load %arg4[%c0_21, %c0_22] : memref<16x16xf32, #tpu.memory_space<vmem>>, vector<16x16xf32>
    %cst_23 = arith.constant dense<0.000000e+00> : vector<48x16xf32>
    %36 = tpu.matmul %3, %35, %cst_23 {dimension_numbers = #tpu.dot_dimension_numbers<[1], [0], [0], [1], [0, 0, 1, 1], [], []>} : vector<48x16xf32>, vector<16x16xf32>, vector<48x16xf32> -> vector<48x16xf32>
    %37 = vector.shape_cast %36 : vector<48x16xf32> to vector<3x16x16xf32>
    %38 = vector.shape_cast %34 : vector<16x16xf32> to vector<1x16x16xf32>
    %39 = vector.broadcast %38 : vector<1x16x16xf32> to vector<3x16x16xf32>
    %40 = arith.mulf %37, %39 : vector<3x16x16xf32>
    %41 = vector.shape_cast %40 : vector<3x16x16xf32> to vector<48x16xf32>
    %c0_24 = arith.constant 0 : index
    %c0_25 = arith.constant 0 : index
    %42 = vector.load %arg10[%c0_24, %c0_25] : memref<16x16xf32, #tpu.memory_space<vmem>>, vector<16x16xf32>
    %cst_26 = arith.constant dense<0.000000e+00> : vector<48x16xf32>
    %43 = tpu.matmul %41, %42, %cst_26 {dimension_numbers = #tpu.dot_dimension_numbers<[1], [0], [0], [1], [0, 0, 1, 1], [], []>} : vector<48x16xf32>, vector<16x16xf32>, vector<48x16xf32> -> vector<48x16xf32>
    %44 = vector.shape_cast %43 : vector<48x16xf32> to vector<3x16x16xf32>
    %45 = arith.mulf %40, %44 : vector<3x16x16xf32>
    %cst_27 = arith.constant dense<0.000000e+00> : vector<16x16xf32>
    %46 = vector.multi_reduction <add>, %45, %cst_27 [0] : vector<3x16x16xf32> to vector<16x16xf32>
    %47 = arith.mulf %44, %44 : vector<3x16x16xf32>
    %cst_28 = arith.constant dense<0.000000e+00> : vector<16x16xf32>
    %48 = vector.multi_reduction <add>, %47, %cst_28 [0] : vector<3x16x16xf32> to vector<16x16xf32>
    %cst_29 = arith.constant 9.99999997E-7 : f32
    %49 = vector.broadcast %cst_29 : f32 to vector<16x16xf32>
    %50 = arith.addf %48, %49 : vector<16x16xf32>
    %51 = tpu.reciprocal %50 {approx = true} : vector<16x16xf32> -> vector<16x16xf32>
    %52 = arith.mulf %50, %51 : vector<16x16xf32>
    %cst_30 = arith.constant 2.000000e+00 : f32
    %53 = vector.broadcast %cst_30 : f32 to vector<16x16xf32>
    %54 = arith.subf %53, %52 : vector<16x16xf32>
    %55 = arith.mulf %51, %54 : vector<16x16xf32>
    %56 = arith.mulf %46, %55 : vector<16x16xf32>
    %cst_31 = arith.constant 0.00999999977 : f32
    %57 = vector.broadcast %cst_31 : f32 to vector<3x16x16xf32>
    %58 = arith.mulf %57, %40 : vector<3x16x16xf32>
    %59 = vector.shape_cast %56 : vector<16x16xf32> to vector<1x16x16xf32>
    %60 = vector.broadcast %59 : vector<1x16x16xf32> to vector<3x16x16xf32>
    %61 = arith.mulf %60, %44 : vector<3x16x16xf32>
    %62 = arith.subf %40, %61 : vector<3x16x16xf32>
    %cst_32 = arith.constant 9.900000e-01 : f32
    %63 = vector.broadcast %cst_32 : f32 to vector<3x16x16xf32>
    %64 = arith.mulf %63, %62 : vector<3x16x16xf32>
    %65 = arith.addf %58, %64 : vector<3x16x16xf32>
    %cst_33 = arith.constant 0.000000e+00 : f32
    %66 = vector.broadcast %cst_33 : f32 to vector<16x16xf32>
    %67 = arith.cmpf oge, %46, %66 : vector<16x16xf32>
    %68 = vector.shape_cast %67 : vector<16x16xi1> to vector<1x16x16xi1>
    %69 = vector.broadcast %68 : vector<1x16x16xi1> to vector<3x16x16xi1>
    %70 = arith.select %69, %40, %65 : vector<3x16x16xi1>, vector<3x16x16xf32>
    %c0_34 = arith.constant 0 : index
    %c0_35 = arith.constant 0 : index
    %c0_36 = arith.constant 0 : index
    %71 = vector.load %arg12[%c0_34, %c0_35, %c0_36] : memref<3x16x16xf32, #tpu.memory_space<vmem>>, vector<3x16x16xf32>
    tpu.vector_store %arg12[%c0_34, %c0_35, %c0_36], %70 {strides = array<i32>} : memref<3x16x16xf32, #tpu.memory_space<vmem>>, vector<3x16x16xf32>,
    %cst_37 = arith.constant 0.000000e+00 : f32
    %72 = vector.broadcast %cst_37 : f32 to vector<16x32xf32>
    %73 = arith.cmpf oge, %24, %72 : vector<16x32xf32>
    %cst_38 = arith.constant 0.00999999977 : f32
    %74 = vector.broadcast %cst_38 : f32 to vector<16x32xf32>
    %75 = arith.mulf %74, %24 : vector<16x32xf32>
    %76 = arith.select %73, %24, %75 : vector<16x32xi1>, vector<16x32xf32>
    %c0_39 = arith.constant 0 : index
    %c0_40 = arith.constant 0 : index
    %77 = vector.load %arg11[%c0_39, %c0_40] : memref<16x32xf32, #tpu.memory_space<vmem>>, vector<16x32xf32>
    tpu.vector_store %arg11[%c0_39, %c0_40], %76 {strides = array<i32>} : memref<16x32xf32, #tpu.memory_space<vmem>>, vector<16x32xf32>,
    return
  }
  func.func @transform_0(%arg0: i32) -> (i32, i32) {
    %c0_i32 = arith.constant 0 : i32
    %c0_i32_0 = arith.constant 0 : i32
    return %arg0, %c0_i32 : i32, i32
  }
  func.func @transform_1(%arg0: i32) -> (i32, i32, i32) {
    %c0_i32 = arith.constant 0 : i32
    %c0_i32_0 = arith.constant 0 : i32
    %c0_i32_1 = arith.constant 0 : i32
    return %c0_i32, %arg0, %c0_i32_0 : i32, i32, i32
  }
  func.func @transform_2(%arg0: i32) -> (i32, i32) {
    %c0_i32 = arith.constant 0 : i32
    %c0_i32_0 = arith.constant 0 : i32
    %c0_i32_1 = arith.constant 0 : i32
    return %c0_i32, %c0_i32_0 : i32, i32
  }
  func.func @transform_3(%arg0: i32) -> (i32, i32) {
    %c0_i32 = arith.constant 0 : i32
    %c0_i32_0 = arith.constant 0 : i32
    %c0_i32_1 = arith.constant 0 : i32
    return %c0_i32, %c0_i32_0 : i32, i32
  }
  func.func @transform_4(%arg0: i32) -> (i32, i32) {
    %c0_i32 = arith.constant 0 : i32
    %c0_i32_0 = arith.constant 0 : i32
    %c0_i32_1 = arith.constant 0 : i32
    return %c0_i32, %c0_i32_0 : i32, i32
  }
  func.func @transform_5(%arg0: i32) -> (i32, i32) {
    %c0_i32 = arith.constant 0 : i32
    %c0_i32_0 = arith.constant 0 : i32
    %c0_i32_1 = arith.constant 0 : i32
    return %c0_i32, %c0_i32_0 : i32, i32
  }
  func.func @transform_6(%arg0: i32) -> (i32, i32) {
    %c0_i32 = arith.constant 0 : i32
    %c0_i32_0 = arith.constant 0 : i32
    %c0_i32_1 = arith.constant 0 : i32
    return %c0_i32, %c0_i32_0 : i32, i32
  }
  func.func @transform_7(%arg0: i32) -> (i32, i32) {
    %c0_i32 = arith.constant 0 : i32
    %c0_i32_0 = arith.constant 0 : i32
    %c0_i32_1 = arith.constant 0 : i32
    return %c0_i32, %c0_i32_0 : i32, i32
  }
  func.func @transform_8(%arg0: i32) -> (i32, i32) {
    %c0_i32 = arith.constant 0 : i32
    %c0_i32_0 = arith.constant 0 : i32
    %c0_i32_1 = arith.constant 0 : i32
    return %c0_i32, %c0_i32_0 : i32, i32
  }
  func.func @transform_9(%arg0: i32) -> (i32, i32) {
    %c0_i32 = arith.constant 0 : i32
    %c0_i32_0 = arith.constant 0 : i32
    %c0_i32_1 = arith.constant 0 : i32
    return %c0_i32, %c0_i32_0 : i32, i32
  }
  func.func @transform_10(%arg0: i32) -> (i32, i32) {
    %c0_i32 = arith.constant 0 : i32
    %c0_i32_0 = arith.constant 0 : i32
    return %arg0, %c0_i32 : i32, i32
  }
  func.func @transform_11(%arg0: i32) -> (i32, i32, i32) {
    %c0_i32 = arith.constant 0 : i32
    %c0_i32_0 = arith.constant 0 : i32
    %c0_i32_1 = arith.constant 0 : i32
    return %c0_i32, %arg0, %c0_i32_0 : i32, i32, i32
  }
}

</mosaic_0001>

<bundles_post_ra>
// kernel: gdb_perceptron_vn.1
= control target key start
LH: loop header
LB: loop body
LE: loop exit
PB: predicated region body
PF: predicated region fallthrough
CT: control target
= control target key end

     0   :  { %s2131_s0 = inlined_call_operand.vmem [shape: f32[32,16], index: 0, kind: input, shape index: {}]   ;;  %s2132_s1 = inlined_call_operand.vmem [shape: f32[3,32,8], index: 1, kind: input, shape index: {}]   ;;  %s2133_s2 = inlined_call_operand.vmem [shape: f32[8,16], index: 2, kind: input, shape index: {}]   ;;  %s2134_s3 = inlined_call_operand.vmem [shape: f32[16,16], index: 3, kind: input, shape index: {}]   ;;  %s2135_s4 = inlined_call_operand.vmem [shape: f32[16,16], index: 4, kind: input, shape index: {}]   ;;  %s2136_s5 = inlined_call_operand.vmem [shape: f32[16,32], index: 5, kind: input, shape index: {}]   ;;  %s2137_s6 = inlined_call_operand.vmem [shape: f32[16,32], index: 6, kind: input, shape index: {}]   ;;  %s2138_s7 = inlined_call_operand.vmem [shape: f32[32,16], index: 7, kind: input, shape index: {}]   ;;  %s2139_s8 = inlined_call_operand.vmem [shape: f32[1,16], index: 8, kind: input, shape index: {}]   ;;  %s2140_s9 = inlined_call_operand.vmem [shape: f32[16,16], index: 9, kind: input, shape index: {}]   ;;  %s2141_s10 = inlined_call_operand.hbm [shape: f32[32,32], index: 10, kind: output, shape index: {0}]   ;;  %s2142_s11 = inlined_call_operand.vmem [shape: f32[3,32,16], index: 11, kind: output, shape index: {1}]  }
   0x1   :  { %2144 = sst [smem:[#allocation7_spill]] %s2131_s0 }
   0x2   :  { %2145 = sst [smem:[#allocation8_spill]] %s2132_s1 }
   0x3   :  { %17 = vsyncpa [#allocation4], 0 }
   0x4   :  { %19 = vsyncpa [#allocation4 + $0x1], 0  ;;  %s1868_s17 = smov 0   ;;  %s1870_s18 = smov 0  }
   0x5   :  { %s1872_s19 = smov 0   ;;  %s1874_s20 = smov 0  }
   0x6 LB: > { %s1889_s21 = sadd.s32 4294967295, %s1803_s20   ;;  %s1494_s22 = sadd.s32 4294967294, %s1803_s20   ;;  %s1803_s20 = sphi %s1874_s20, %s2155_s20   ;;  %s1799_s19 = sphi %s1872_s19, %s2154_s19   ;;  %s1795_s18 = sphi %s1870_s18, %s2153_s18   ;;  %s1791_s17 = sphi %s1868_s17, %s2152_s17  }
   0x7   : > { %s1893_s23 = sadd.s32 1, %s1803_s20   ;;  %s58_s24 = sadd.s32 1, %s1799_s19 }
   0x8   : > { %s55_s25 = ssub.s32 %s1803_s20, %s1893_s23  ;;  %p65_p0 = scmp.ne.s32.totalorder %s1799_s19, %s1795_s18 }
   0x9   : > { %p56_p1 = scmp.eq.s32.totalorder %s55_s25, 0  ;;  %p66_p2 = scmp.eq.s32.totalorder %s1803_s20, 0 }
   0xa   : > { %p263_p3 = scmp.eq.s32.totalorder %s1889_s21, 1  ;;  %p268_p4 = scmp.ne.s32.totalorder %s1795_s18, %s1791_s17 }
   0xb   : > { %s1905_s26 = scalar_select %p56_p1, %s1799_s19, %s58_s24  }
   0xc   : > { %p67_p5 = por %p66_p2, %p65_p0  ;;  %p1907_p6 = por %p263_p3, %p65_p0 }
   0xd   : > { %p269_p7 = scmp.eq.s32.totalorder %s1494_s22, 1  ;;  %p1496_p9 = scmp.ge.s32.totalorder %s1803_s20, 2 }
   0xf   : > { %p1911_p8 = por %p269_p7, %p268_p4  ;;  %335 = sbr.rel (%p1496_p9) target bundleno = 35 (0x23), region = 48 }
  0x16   : > { %347 = sbr.rel (!%p67_p5) target bundleno = 35 (0x23), region = 56  ;;  %s349_s29 = sand.u32 (%p67_p5), 1, %s1799_s19  }
  0x17   : > { %s1539_s30 = sshll.u32 (%p67_p5), %s1803_s20, 4  ;;  %s1682_s12 = smul.u32 (%p67_p5), 48, %s349_s29 }
  0x18   : > { %s2148_s1 = sld [smem:[#allocation8_spill]] (%p67_p5) }
  0x19   : > { %s351_s16 = scalar_lea.vmem (%p67_p5), [#allocation2], %s1682_s12 }
  0x1e   : > { %s354_s15 = scalar_lea.vmem %s2148_s1, %s1539_s30 }
  0x1f   : > { %v392_v0 = vld [vmem:[%s354_s15] sm:$0xff]  ;;  %v394_v1 = vld [vmem:[%s354_s15 + $0x8] sm:$0xff] }
  0x20   : > { %v396_v2 = vld [vmem:[%s354_s15 + $0x20] sm:$0xff]  ;;  %v398_v3 = vld [vmem:[%s354_s15 + $0x28] sm:$0xff]  ;;  %393 = vst [vmem:[%s351_s16] sm:$0xff] %v392_v0  ;;  %395 = vst [vmem:[%s351_s16 + $0x8] sm:$0xff] %v394_v1 }
  0x21   : > { %v400_v4 = vld [vmem:[%s354_s15 + $0x40] sm:$0xff]  ;;  %v402_v5 = vld [vmem:[%s354_s15 + $0x48] sm:$0xff]  ;;  %397 = vst [vmem:[%s351_s16 + $0x10] sm:$0xff] %v396_v2  ;;  %399 = vst [vmem:[%s351_s16 + $0x18] sm:$0xff] %v398_v3 }
  0x22   : > { %401 = vst [vmem:[%s351_s16 + $0x20] sm:$0xff] %v400_v4  ;;  %403 = vst [vmem:[%s351_s16 + $0x28] sm:$0xff] %v402_v5 }
  0x23 PF: > { %p1499_p10 = scmp.ge.s32.totalorder %s1803_s20, 1  ;;  %p408_p11 = scmp.lt.s32.totalorder %s1803_s20, 3 }
  0x25   : > { %p409_p12 = pnand %p1499_p10, %p408_p11 }
  0x26   : > { %v478_v6 = vld [vmem:[%s2133_s2] sm:$0xff] (!%p409_p12)  ;;  %s1929_s25 = sand.u32 (!%p409_p12), 1, %s1795_s18   ;;  %v620_v8 = vld [vmem:[%s2135_s4 + $0x8] sm:$0xff] (!%p409_p12)  ;;  %s1501_s14 = sshll.u32 (!%p409_p12), %s1889_s21, 1  ;;  %vm479_vm0 = vcmask (!%p409_p12), 64512   ;;  %vm621_vm1 = vcmask (!%p409_p12), 130048  }
  0x27   : > { %412 = sbr.rel (%p409_p12) target bundleno = 1010 (0x3f2), region = 94  ;;  %v619_v7 = vld [vmem:[%s2135_s4] sm:$0xff] (!%p409_p12)  ;;  %1583 = vmatprep.subr.mxu0 (!%p409_p12), %v478_v6  ;;  %p464_p13 = scmp.lt.s32.totalorder (!%p409_p12), %s1501_s14, 3  ;;  %v706_v19 = vld [vmem:[%s2137_s6 + $0x8] sm:$0xff] (!%p409_p12)  ;;  %v871_v26 = vld [vmem:[%s2138_s7 + $0x10] sm:$0xff] (!%p409_p12)  ;;  %vm880_vm6 = vcmask (!%p409_p12), 261120  }
  0x28   : > { %s2143_s15 = smul.u32 (!%p409_p12), 48, %s1929_s25  ;;  %v1652_v9 = vpack.c.bf16 (!%p409_p12), %v620_v8, %v619_v7  ;;  %1584 = vmatpush3.msra.mxu0 (!%p409_p12), %v478_v6  ;;  %s2149_s0 = sld [smem:[#allocation7_spill]] (!%p409_p12)  ;;  %v705_v18 = vld [vmem:[%s2137_s6] sm:$0xff] (!%p409_p12)  ;;  %v704_v22 = vld [vmem:[%s2136_s5 + $0x8] sm:$0xff] (!%p409_p12)  ;;  %v872_v28 = vld [vmem:[%s2138_s7 + $0x18] sm:$0xff] (!%p409_p12) }
  0x29   : > { %v703_v20 = vld [vmem:[%s2136_s5] sm:$0xff] (!%p409_p12)  ;;  %v1656_v21 = vpack.c.bf16 (!%p409_p12), %v706_v19, %v705_v18  ;;  %v870_v25 = vld [vmem:[%s2138_s7 + $0x8] sm:$0xff] (!%p409_p12)  ;;  %v1668_v29 = vpack.c.bf16 (!%p409_p12), %v872_v28, %v871_v26  ;;  %s1540_s13 = sshll.u32 (!%p409_p12), %s1889_s21, 8  ;;  %s1805_s12 = smov (!%p409_p12), [#allocation3]  }
  0x2a   : > { %1653 = vmatprep.subr.bf16.mxu1 (!%p409_p12), %v1652_v9  ;;  %s417_s16 = scalar_lea.vmem (!%p409_p12), [#allocation2], %s2143_s15  ;;  %v1660_v23 = vpack.c.bf16 (!%p409_p12), %v704_v22, %v703_v20  ;;  %v869_v24 = vld [vmem:[%s2138_s7] sm:$0xff] (!%p409_p12)  ;;  %v975_v33 = vld [vmem:[%s2134_s3 + $0x8] sm:$0xff] (!%p409_p12)  ;;  %s2035_s15 = scalar_lea.hbm (!%p409_p12), %s2141_s10, %s1540_s13 }
  0x2b   : > { %v472_v10 = vld [vmem:[%s417_s16] sm:$0xff] (!%p409_p12)  ;;  %v473_v11 = vld [vmem:[%s417_s16 + $0x8] sm:$0xff] (!%p409_p12)  ;;  %v474_v12 = vld [vmem:[%s417_s16 + $0x10] sm:$0xff] (!%p409_p12)  ;;  %1655 = vmatpush3.bf16.msra.mxu1 (!%p409_p12), %v1652_v9  ;;  %v1664_v27 = vpack.c.bf16 (!%p409_p12), %v870_v25, %v869_v24 }
  0x2c   : > { %1585 = vmatprep.mubr.msk.f32.mxu0 (!%p409_p12), %vm479_vm0, %v472_v10  ;;  %v475_v13 = vld [vmem:[%s417_s16 + $0x18] sm:$0xff] (!%p409_p12)  ;;  %v476_v14 = vld [vmem:[%s417_s16 + $0x20] sm:$0xff] (!%p409_p12)  ;;  %v477_v17 = vld [vmem:[%s417_s16 + $0x28] sm:$0xff] (!%p409_p12)  ;;  %1657 = vmatprep.subr.bf16.mxu1 (!%p409_p12), %v1656_v21 }
  0x2d   : > { %1586 = vmatmul.mubr.msk.f32.vlgmr.msra.gmra.mrb[0].mxu0 (!%p409_p12), %vm479_vm0, %v473_v11  ;;  %1665 = vmatprep.subr.bf16.mxu0 (!%p409_p12), %v1664_v27  ;;  %v974_v32 = vld [vmem:[%s2134_s3] sm:$0xff] (!%p409_p12)  ;;  %v1096_v10 = vld [vmem:[%s2140_s9 + $0x8] sm:$0xff] (!%p409_p12) }
  0x2e   : > { %s2157_s14 = smov (!%p464_p13, %s1501_s14), 3  ;;  %1588 = vmatprep.mubr.msk.f32.mxu0 %vm479_vm0, %v474_v12  ;;  %1667 = vmatpush3.bf16.msra.mxu0 %v1664_v27  ;;  %v1672_v40 = vpack.c.bf16 %v975_v33, %v974_v32  ;;  %v1095_v9 = vld [vmem:[%s2140_s9] sm:$0xff] }
  0x2f   : > { %s1502_s22 = sshll.u32 %s2157_s14, 3  ;;  %1669 = vmatprep.subr.bf16.mxu0 %v1668_v29  ;;  %s1500_s14 = sshll.u32 %s1929_s25, 4  ;;  %v1676_v11 = vpack.c.bf16 %v1096_v10, %v1095_v9  ;;  %v1515_v12 = vld [vmem:[%s2139_s8] ss:$0 sm:$0xff] }
  0x30   : > { %s467_s30 = scalar_lea.vmem %s2149_s0, %s1502_s22  ;;  %s1993_s22 = scalar_lea.vmem [#allocation3], %s1500_s14 }
  0x31   : > { %v617_v15 = vld [vmem:[%s467_s30] sm:$0xff]  ;;  %v618_v16 = vld [vmem:[%s467_s30 + $0x8] sm:$0xff]  ;;  %1589 = vmatmul.mubr.msk.f32.gmra.mrb[2].mxu0 %vm479_vm0, %v475_v13  ;;  %s1328_s14 = sshll.u32 %s1993_s22, 4  ;;  %s1745_s0 = sshll.u32 %s1805_s12, 4  ;;  %s2037_s14 = int_to_ptr.vmem [resolvable:$true] %s1328_s14  ;;  %s1746_s0 = int_to_ptr.vmem [resolvable:$false] %s1745_s0 }
  0x32   : > { %1598 = vmatprep.mubr.msk.f32.mxu1 %vm621_vm1, %v617_v15  ;;  %1591 = vmatprep.mubr.msk.f32.mxu0 %vm479_vm0, %v476_v14  ;;  %s1741_s16 = scalar_lea.vmem %s2037_s14, 256  ;;  %p1748_p3 = scmp.lt.s32.totalorder %s2037_s14, %s1746_s0 }
  0x33   : > { %1599 = vmatmul.mubr.msk.f32.vlgmr.msra.gmra.mrb[0].mxu1 %vm621_vm1, %v618_v16  ;;  %1671 = vmatpush3.bf16.msra.mxu0 %v1668_v29  ;;  %p1742_p0 = scmp.ne.s32.totalorder %s2037_s14, %s1741_s16 }
  0x34   : > { %1659 = vmatpush3.bf16.msra.mxu1 %v1656_v21  ;;  %1677 = vmatprep.subr.bf16.mxu0 %v1676_v11 }
  0x35   : > { %1592 = vmatmul.mubr.msk.f32.gmra.mrb[4].mxu0 %vm479_vm0, %v477_v17  ;;  %1661 = vmatprep.subr.bf16.mxu1 %v1660_v23  ;;  %p1743_p1 = pnand %p1742_p0, %p1907_p6 }
  0x37   : > { %p1744_p2 = pneg %p1743_p1 }
 0x100   : > { %v1587_v30 = vpop.f32.mrb[0].mxu0 }
 0x101   : > { %v564_v31 = vpop.f32.mrb[1].mxu0  ;;  %v594_v36 = vmul.f32 %v1587_v30, %v1587_v30 }
 0x102   : > { %v593_v41 = vmul.f32 %v564_v31, %v564_v31 }
 0x104   : > { %v1590_v34 = vpop.f32.mrb[2].mxu0 }
 0x105   : > { %v596_v37 = vmul.f32 %v1590_v34, %v1590_v34  ;;  %v574_v38 = vpop.f32.mrb[3].mxu0 }
 0x106   : > { %v1600_v35 = vpop.f32.mrb[0].mxu1  ;;  %v595_v42 = vmul.f32 %v574_v38, %v574_v38 }
 0x107   : > { %v694_v39 = vpop.f32.mrb[1].mxu1  ;;  %v598_v43 = vadd.f32 %v596_v37, %v594_v36 }
 0x108   : > { %1605 = vmatprep.mubr.msk.f32.mxu1 %vm621_vm1, %v694_v39  ;;  %v597_v44 = vadd.f32 %v595_v42, %v593_v41  ;;  %v1593_v45 = vpop.f32.mrb[4].mxu0 }
 0x109   : > { %1606 = vmatmul.mubr.msk.f32.vlgmr.msra.gmra.mrb[2].mxu1 %vm621_vm1, %v1600_v35  ;;  %v600_v46 = vmul.f32 %v1593_v45, %v1593_v45  ;;  %v584_v47 = vpop.f32.mrb[5].mxu0 }
 0x10a   : > { %1663 = vmatpush3.bf16.msra.mxu1 %v1660_v23  ;;  %v599_v48 = vmul.f32 %v584_v47, %v584_v47 }
 0x10b   : > { %1673 = vmatprep.subr.bf16.mxu1 %v1672_v40  ;;  %v602_v49 = vadd.f32 %v600_v46, %v598_v43 }
 0x10c   : > { %v601_v50 = vadd.f32 %v599_v48, %v597_v44 }
 0x10d   : > { %1725 = vrsqrt.f32 %v602_v49  ;;  %vm612_vm2 = vcmp.eq.f32.partialorder %v602_v49, inf  ;;  %v615_v58 = vand.u32 2147483648, %v602_v49  ;;  %vm614_vm5 = vcmp.eq.f32.partialorder %v602_v49, 0.0 }
 0x10e   : > { %1727 = vrsqrt.f32 %v601_v50  ;;  %vm605_vm3 = vcmp.eq.f32.partialorder %v601_v50, inf  ;;  %v608_v55 = vand.u32 2147483648, %v601_v50  ;;  %vm607_vm4 = vcmp.eq.f32.partialorder %v601_v50, 0.0 }
 0x117   : > { %v1726_v51 = vpop.eup %1725 }
 0x118   : > { %v1728_v52 = vpop.eup %1727  ;;  %v611_v53 = vmul.f32 %v1726_v51, %v602_v49 }
 0x119   : > { %v604_v54 = vmul.f32 %v1728_v52, %v601_v50 }
 0x11a   : > { %v613_v56 = vsel %vm612_vm2, %v602_v49, %v611_v53 }
 0x11b   : > { %v606_v57 = vsel %vm605_vm3, %v601_v50, %v604_v54  ;;  %v616_v60 = vsel %vm614_vm5, %v615_v58, %v613_v56 }
 0x11c   : > { %v609_v59 = vsel %vm607_vm4, %v608_v55, %v606_v57 }
 0x11d   : > { %1612 = vmatprep.mubr.msk.f32.mxu1 %vm621_vm1, %v609_v59 }
 0x11e   : > { %1613 = vmatmul.mubr.msk.f32.vlgmr.msra.gmra.mrb[2].mxu1 %vm621_vm1, %v616_v60 }
 0x11f   : > { %1675 = vmatpush3.bf16.msra.mxu1 %v1672_v40  ;;  %1630 = vmatprep.mubr.msk.f32.mxu1 %vm621_vm1, %v564_v31 }
 0x122   : > { %1631 = vmatmul.mubr.msk.f32.vlgmr.msra.gmra.mrb[4].mxu1 %vm621_vm1, %v1587_v30 }
 0x123   : > { %1633 = vmatprep.mubr.msk.f32.mxu1 %vm621_vm1, %v574_v38 }
 0x126   : > { %1634 = vmatmul.mubr.msk.f32.gmra.mrb[6].mxu1 %vm621_vm1, %v1590_v34 }
 0x127   : > { %1636 = vmatprep.mubr.msk.f32.mxu1 %vm621_vm1, %v584_v47 }
 0x12a   : > { %1637 = vmatmul.mubr.msk.f32.gmra.mrb[8].mxu1 %vm621_vm1, %v1593_v45 }
 0x1f1   : > { %v1614_v61 = vpop.f32.mrb[2].mxu1 }
 0x1f2   : > { %vm1303_vm7 = vcmp.ge.f32.partialorder %v1614_v61, 0.0  ;;  %v1305_v62 = vmul.f32 0.01, %v1614_v61  ;;  %v860_v63 = vpop.f32.mrb[3].mxu1 }
 0x1f3   : > { %vm1302_vm8 = vcmp.ge.f32.partialorder %v860_v63, 0.0  ;;  %v1304_v0 = vmul.f32 0.01, %v860_v63  ;;  %1623 = vmatprep.mubr.msk.f32.mxu0 %vm880_vm6, %v860_v63 }
 0x1f4   : > { %v1307_v1 = vsel %vm1303_vm7, %v1614_v61, %v1305_v62  ;;  %1624 = vmatmul.mubr.msk.f32.vlgmr.msra.gmra.mrb[6].mxu0 %vm880_vm6, %v1614_v61 }
 0x1f5   : > { %v1306_v2 = vsel %vm1302_vm8, %v860_v63, %v1304_v0  ;;  %1309 = vst.msk [vmem:[%s1993_s22 + $0x8] sm:$0xff] %vm880_vm6, %v1307_v1  ;;  %v1632_v3 = vpop.f32.mrb[4].mxu1  ;;  %1679 = vmatpush3.bf16.msra.mxu0 %v1676_v11 }
 0x1f6   : > { %1308 = vst.msk [vmem:[%s1993_s22] sm:$0xff] %vm880_vm6, %v1306_v2  ;;  %v1060_v4 = vpop.f32.mrb[5].mxu1  ;;  %s1747_s22 = scalar_lea.vmem %s1746_s0, 512 }
 0x1f7   : > { %p1749_p4 = scmp.lt.s32.totalorder %s1747_s22, %s1741_s16 }
 0x1f9   : > { %v1635_v5 = vpop.f32.mrb[6].mxu1  ;;  %p1750_p5 = por %p1749_p4, %p1748_p3 }
 0x1fa   : > { %v1070_v6 = vpop.f32.mrb[7].mxu1 }
 0x1fb   : > { %p1751_p7 = pnand %p1750_p5, %p1744_p2 }
 0x1fd   : > { %v1638_v7 = vpop.f32.mrb[8].mxu1 }
 0x1fe   : > { %v1080_v8 = vpop.f32.mrb[9].mxu1 }
 0x2c7   : > { %v1625_v13 = vpop.f32.mrb[6].mxu0 }
 0x2c8   : > { %v959_v14 = vadd.f32 %v1625_v13, %v1515_v12  ;;  %v953_v15 = vpop.f32.mrb[7].mxu0 }
 0x2c9   : > { %v954_v16 = vadd.f32 %v1515_v12, %v953_v15 }
 0x2ca   : > { %v1519_v17 = vmul.f32 -1.442695, %v959_v14 }
 0x2cb   : > { %v1518_v18 = vmul.f32 -1.442695, %v954_v16 }
 0x2cc   : > { %1729 = vpow2.f32 %v1519_v17 }
 0x2cd   : > { %1731 = vpow2.f32 %v1518_v18 }
 0x2d6   : > { %v1730_v19 = vpop.eup %1729 }
 0x2d7   : > { %v1732_v20 = vpop.eup %1731  ;;  %v969_v21 = vadd.f32 1.0, %v1730_v19 }
 0x2d8   : > { %v968_v22 = vadd.f32 1.0, %v1732_v20 }
 0x2d9   : > { %1733 = vrcp.f32 %v969_v21 }
 0x2da   : > { %1735 = vrcp.f32 %v968_v22 }
 0x2e3   : > { %v1734_v23 = vpop.eup %1733 }
 0x2e4   : > { %v1736_v24 = vpop.eup %1735  ;;  %v2006_v25 = vmul.f32 %v1734_v23, %v1632_v3  ;;  %v2008_v26 = vmul.f32 %v1734_v23, %v1635_v5  ;;  %v2010_v27 = vmul.f32 %v1734_v23, %v1638_v7 }
 0x2e5   : > { %v2012_v28 = vmul.f32 %v1736_v24, %v1060_v4  ;;  %v2014_v29 = vmul.f32 %v1736_v24, %v1070_v6  ;;  %v2016_v30 = vmul.f32 %v1736_v24, %v1080_v8 }
 0x2e7   : > { %1643 = vmatprep.mubr.msk.f32.mxu0 %vm621_vm1, %v2012_v28 }
 0x2e8   : > { %1644 = vmatmul.mubr.msk.f32.vlgmr.msra.gmra.mrb[8].mxu0 %vm621_vm1, %v2006_v25 }
 0x2e9   : > { %1646 = vmatprep.mubr.msk.f32.mxu0 %vm621_vm1, %v2014_v29 }
 0x2ec   : > { %1647 = vmatmul.mubr.msk.f32.gmra.mrb[10].mxu0 %vm621_vm1, %v2008_v26 }
 0x2ed   : > { %1649 = vmatprep.mubr.msk.f32.mxu0 %vm621_vm1, %v2016_v30 }
 0x2f0   : > { %1650 = vmatmul.mubr.msk.f32.gmra.mrb[12].mxu0 %vm621_vm1, %v2010_v27 }
 0x2f1   : > { %1754 = shalt.err (!%p1751_p7)
}
 0x2f2   : > { %s1755_s13 = scalar_lea.hbm %s2035_s15, 256  ;;  %s1759_s12 = scalar_lea.hbm %s2141_s10, 512 }
 0x2f3   : > { %p1756_p10 = scmp.ne.s32.totalorder %s2035_s15, %s1755_s13  ;;  %p1760_p13 = scmp.lt.u32.totalorder %s2035_s15, %s2141_s10 }
 0x2f4   : > { %p1761_p0 = scmp.lt.u32.totalorder %s1759_s12, %s1755_s13  ;;  %p1763_p2 = scmp.lt.u32.totalorder %s1755_s13, %s2035_s15 }
 0x2f5   : > { %p1757_p11 = pnand %p1756_p10, %p1907_p6 }
 0x2f6   : > { %p1762_p1 = por %p1761_p0, %p1760_p13 }
 0x2f7   : > { %p1758_p12 = pneg %p1757_p11 }
 0x2f8   : > { %p1764_p3 = por %p1763_p2, %p1762_p1 }
 0x2fa   : > { %p1765_p4 = pnand %p1764_p3, %p1758_p12 }
 0x2fc   : > { %1768 = shalt.err (!%p1765_p4)
}
 0x2fd   : > { %s1806_s16 = smov 128   ;;  %s1807_s22 = smov 8   ;;  %v1255_v16 = vmul.f32 0.01, %v2006_v25  ;;  %v1257_v17 = vmul.f32 0.01, %v2008_v26 }
 0x2fe   : > { %s2150_s1 = scalar_lea.sflag [#allocation4], %s1929_s25  ;;  %v1259_v19 = vmul.f32 0.01, %v2010_v27  ;;  %v1254_v23 = vmul.f32 0.01, %v2012_v28 }
 0x2ff   : > { %1684 = dma.vmem_to_hbm [thread:$0]  (%p1907_p6), %s2037_s14, 256, %s2035_s15, %s2150_s1, %s1806_s16, %s1806_s16, %s1807_s22  }
 0x300   : > { %s2151_s1 = smul.u32 48, %s1929_s25  ;;  %s1541_s25 = sshll.u32 (%p1907_p6), %s1889_s21, 4 }
 0x301   : > { %s1340_s13 = scalar_lea.vmem (%p1907_p6), %s2142_s11, %s1541_s25 }
 0x302   : > { %s462_s14 = scalar_lea.vmem [#allocation5], %s2151_s1 }
 0x3bb   : > { %v1645_v31 = vpop.f32.mrb[8].mxu0 }
 0x3bc   : > { %v1181_v32 = vpop.f32.mrb[9].mxu0  ;;  %v1211_v33 = vmul.f32 %v1645_v31, %v2006_v25  ;;  %v1227_v34 = vmul.f32 %v1645_v31, %v1645_v31 }
 0x3bd   : > { %v1210_v35 = vmul.f32 %v1181_v32, %v2012_v28  ;;  %v1226_v36 = vmul.f32 %v1181_v32, %v1181_v32 }
 0x3be   : > { %v1221_v41 = vsel %vm621_vm1, %v1211_v33, 0.0  ;;  %v1237_v42 = vsel %vm621_vm1, %v1227_v34, 0.0 }
 0x3bf   : > { %v1648_v37 = vpop.f32.mrb[10].mxu0  ;;  %v1216_v45 = vsel %vm621_vm1, %v1210_v35, 0.0  ;;  %v1232_v46 = vsel %vm621_vm1, %v1226_v36, 0.0 }
 0x3c0   : > { %v1213_v38 = vmul.f32 %v1648_v37, %v2008_v26  ;;  %v1229_v39 = vmul.f32 %v1648_v37, %v1648_v37  ;;  %v1191_v40 = vpop.f32.mrb[11].mxu0 }
 0x3c1   : > { %v1212_v43 = vmul.f32 %v1191_v40, %v2014_v29  ;;  %v1228_v44 = vmul.f32 %v1191_v40, %v1191_v40 }
 0x3c2   : > { %v1222_v47 = vsel %vm621_vm1, %v1213_v38, 0.0  ;;  %v1238_v48 = vsel %vm621_vm1, %v1229_v39, 0.0  ;;  %v1256_v39 = vmul.f32 0.01, %v2014_v29 }
 0x3c3   : > { %v1223_v49 = vadd.f32 %v1222_v47, %v1221_v41  ;;  %v1239_v50 = vadd.f32 %v1238_v48, %v1237_v42  ;;  %v1217_v51 = vsel %vm621_vm1, %v1212_v43, 0.0  ;;  %v1233_v52 = vsel %vm621_vm1, %v1228_v44, 0.0  ;;  %v1651_v53 = vpop.f32.mrb[12].mxu0 }
 0x3c4   : > { %v1218_v54 = vadd.f32 %v1217_v51, %v1216_v45  ;;  %v1234_v55 = vadd.f32 %v1233_v52, %v1232_v46  ;;  %v1215_v56 = vmul.f32 %v1651_v53, %v2010_v27  ;;  %v1231_v57 = vmul.f32 %v1651_v53, %v1651_v53  ;;  %v1201_v58 = vpop.f32.mrb[13].mxu0 }
 0x3c5   : > { %v1214_v59 = vmul.f32 %v1201_v58, %v2016_v30  ;;  %v1230_v60 = vmul.f32 %v1201_v58, %v1201_v58  ;;  %v1258_v41 = vmul.f32 0.01, %v2016_v30 }
 0x3c6   : > { %v1224_v61 = vsel %vm621_vm1, %v1215_v56, 0.0  ;;  %v1240_v62 = vsel %vm621_vm1, %v1231_v57, 0.0 }
 0x3c7   : > { %v1225_v63 = vadd.f32 %v1224_v61, %v1223_v49  ;;  %v1241_v0 = vadd.f32 %v1240_v62, %v1239_v50  ;;  %v1219_v1 = vsel %vm621_vm1, %v1214_v59, 0.0  ;;  %v1235_v2 = vsel %vm621_vm1, %v1230_v60, 0.0 }
 0x3c8   : > { %v1220_v3 = vadd.f32 %v1219_v1, %v1218_v54  ;;  %v1236_v4 = vadd.f32 %v1235_v2, %v1234_v55 }
 0x3c9   : > { %v1243_v5 = vadd.f32 1e-06, %v1241_v0  ;;  %vm1285_vm9 = vcmp.ge.f32.partialorder %v1225_v63, 0.0 }
 0x3ca   : > { %v1242_v6 = vadd.f32 1e-06, %v1236_v4  ;;  %vm1284_vm10 = vcmp.ge.f32.partialorder %v1220_v3, 0.0 }
 0x3cb   : > { %1737 = vrcp.f32 %v1243_v5 }
 0x3cc   : > { %1739 = vrcp.f32 %v1242_v6 }
 0x3d5   : > { %v1738_v7 = vpop.eup %1737 }
 0x3d6   : > { %v1740_v8 = vpop.eup %1739  ;;  %v1247_v9 = vmul.f32 %v1738_v7, %v1243_v5 }
 0x3d7   : > { %v1246_v10 = vmul.f32 %v1740_v8, %v1242_v6 }
 0x3d8   : > { %v1249_v11 = vsub.f32 2.0, %v1247_v9 }
 0x3d9   : > { %v1248_v12 = vsub.f32 2.0, %v1246_v10 }
 0x3da   : > { %v1251_v13 = vmul.f32 %v1738_v7, %v1249_v11 }
 0x3db   : > { %v1250_v14 = vmul.f32 %v1740_v8, %v1248_v12 }
 0x3dc   : > { %v1253_v15 = vmul.f32 %v1251_v13, %v1225_v63 }
 0x3dd   : > { %v1252_v18 = vmul.f32 %v1250_v14, %v1220_v3 }
 0x3de   : > { %v1261_v20 = vmul.f32 %v1645_v31, %v1253_v15  ;;  %v1263_v21 = vmul.f32 %v1648_v37, %v1253_v15  ;;  %v1265_v22 = vmul.f32 %v1651_v53, %v1253_v15 }
 0x3df   : > { %v1260_v24 = vmul.f32 %v1252_v18, %v1181_v32  ;;  %v1262_v33 = vmul.f32 %v1252_v18, %v1191_v40  ;;  %v1264_v34 = vmul.f32 %v1252_v18, %v1201_v58 }
 0x3e0   : > { %v1267_v35 = vsub.f32 %v2006_v25, %v1261_v20  ;;  %v1269_v36 = vsub.f32 %v2008_v26, %v1263_v21  ;;  %v1271_v38 = vsub.f32 %v2010_v27, %v1265_v22 }
 0x3e1   : > { %v1266_v42 = vsub.f32 %v2012_v28, %v1260_v24  ;;  %v1268_v31 = vsub.f32 %v2014_v29, %v1262_v33  ;;  %v1270_v37 = vsub.f32 %v2016_v30, %v1264_v34 }
 0x3e2   : > { %v1273_v43 = vmul.f32 0.99, %v1267_v35  ;;  %v1275_v32 = vmul.f32 0.99, %v1269_v36  ;;  %v1277_v40 = vmul.f32 0.99, %v1271_v38 }
 0x3e3   : > { %v1272_v44 = vmul.f32 0.99, %v1266_v42  ;;  %v1274_v45 = vmul.f32 0.99, %v1268_v31  ;;  %v1276_v46 = vmul.f32 0.99, %v1270_v37 }
 0x3e4   : > { %v1279_v47 = vadd.f32 %v1273_v43, %v1255_v16  ;;  %v1281_v48 = vadd.f32 %v1275_v32, %v1257_v17  ;;  %v1283_v49 = vadd.f32 %v1277_v40, %v1259_v19  ;;  %1337 = sbr.rel (!%p1907_p6) target bundleno = 1010 (0x3f2), region = 106 }
 0x3e5   : > { %v1278_v50 = vadd.f32 %v1272_v44, %v1254_v23  ;;  %v1280_v51 = vadd.f32 %v1274_v45, %v1256_v39  ;;  %v1282_v52 = vadd.f32 %v1276_v46, %v1258_v41 }
 0x3e6   : > { %v1291_v53 = vsel %vm1285_vm9, %v2006_v25, %v1279_v47  ;;  %v1293_v54 = vsel %vm1285_vm9, %v2008_v26, %v1281_v48  ;;  %v1295_v55 = vsel %vm1285_vm9, %v2010_v27, %v1283_v49 }
 0x3e7   : > { %1297 = vst.msk [vmem:[%s462_s14 + $0x8] sm:$0xff] %vm621_vm1, %v1291_v53  ;;  %1299 = vst.msk [vmem:[%s462_s14 + $0x18] sm:$0xff] %vm621_vm1, %v1293_v54  ;;  %v1290_v56 = vsel %vm1284_vm10, %v2012_v28, %v1278_v50  ;;  %v1292_v57 = vsel %vm1284_vm10, %v2014_v29, %v1280_v51  ;;  %v1294_v58 = vsel %vm1284_vm10, %v2016_v30, %v1282_v52 }
 0x3e8   : > { %1301 = vst.msk [vmem:[%s462_s14 + $0x28] sm:$0xff] %vm621_vm1, %v1295_v55  ;;  %1296 = vst.msk [vmem:[%s462_s14] sm:$0xff] %vm621_vm1, %v1290_v56 }
 0x3e9   : > { %1298 = vst.msk [vmem:[%s462_s14 + $0x10] sm:$0xff] %vm621_vm1, %v1292_v57  ;;  %1300 = vst.msk [vmem:[%s462_s14 + $0x20] sm:$0xff] %vm621_vm1, %v1294_v58 }
 0x3ee   : > { %v1380_v26 = vld [vmem:[%s462_s14 + $0x8] sm:$0xff]  ;;  %v1384_v28 = vld [vmem:[%s462_s14 + $0x18] sm:$0xff] }
 0x3ef   : > { %v1378_v25 = vld [vmem:[%s462_s14] sm:$0xff]  ;;  %v1388_v30 = vld [vmem:[%s462_s14 + $0x28] sm:$0xff]  ;;  %1381 = vst [vmem:[%s1340_s13 + $0x8] sm:$0xff] %v1380_v26  ;;  %1385 = vst [vmem:[%s1340_s13 + $0x28] sm:$0xff] %v1384_v28 }
 0x3f0   : > { %v1382_v27 = vld [vmem:[%s462_s14 + $0x10] sm:$0xff]  ;;  %v1386_v29 = vld [vmem:[%s462_s14 + $0x20] sm:$0xff]  ;;  %1379 = vst [vmem:[%s1340_s13] sm:$0xff] %v1378_v25  ;;  %1389 = vst [vmem:[%s1340_s13 + $0x48] sm:$0xff] %v1388_v30 }
 0x3f1   : > { %1383 = vst [vmem:[%s1340_s13 + $0x20] sm:$0xff] %v1382_v27  ;;  %1387 = vst [vmem:[%s1340_s13 + $0x40] sm:$0xff] %v1386_v29 }
 0x3f2 PF: > { %s1401_s21 = sand.u32 1, %s1791_s17   ;;  %p1687_p6 = pnand %p1496_p9, %p1911_p8 }
 0x3f3   : > { %s1402_s27 = scalar_lea.sflag [#allocation4], %s1401_s21 }
 0x3f4   : > { %1786 = dma.done.wait (!%p1687_p6), %s1402_s27, 256  }
 0x3f5   : > { %1788 = vsyncadd (!%p1687_p6), %s1402_s27, 4294967040  ;;  %p22_p5 = scmp.ge.s32.totalorder %s1893_s23, 4   ;;  %s2152_s17 = smov %s1795_s18 }
 0x3f6   : > { %s2153_s18 = smov %s1799_s19  ;;  %s2154_s19 = smov %s1905_s26 }
 0x3f7   : > { %s2155_s20 = smov %s1893_s23  ;;  %24 = sbr.rel (!%p22_p5) target bundleno = 6 (0x6), region = 191 }
 0x3fe   :  { %1414 = vsyncpa [#allocation4], 1 }
 0x3ff   :  { %1416 = vsyncpa [#allocation4 + $0x1], 1 }

</bundles_post_ra>
